<compile_context>
chip_gen: v5e
topology: v5e:2x2
jax: 0.10.0
libtpu: 0.0.40
codegen_flags: <defaults>
</compile_context>

<pallas_src>
import jax
import jax.numpy as jnp
from jax import lax
from jax.experimental import pallas as pl
from jax.experimental.pallas import tpu as pltpu


def _round_up(x, m):
    return (x + m - 1) // m * m


def _vmem_capacity_bytes():
    try:
        info = pltpu.get_tpu_info()
        cap = getattr(info, "vmem_capacity_bytes", None)
        if cap:
            return int(cap)
    except Exception:
        pass
    return 64 * 1024 * 1024  # conservative default (v7x per-TensorCore VMEM)


def _make_pool_kernel(*, s, td, pad_d, pad_h, pad_w, H, W, Ho, Wo, has_halo, dtype):
    """Kernel body.  Block layouts (leading N*C grid dim squeezed):
         x_ref    : (td*s, H, W)  raw (unpadded) input rows of this D tile
         halo_ref : (s,    H, W)  last stride-group of the previous D tile (optional)
         o_ref    : (td, Ho, Wo)
         dacc     : (td, H,  W)   VMEM scratch: result of the D reduction
         hacc     : (td, Ho, W)   VMEM scratch: result of the H reduction
    """

    def kernel(*refs):
        if has_halo:
            x_ref, halo_ref, o_ref, dacc, hacc = refs
        else:
            x_ref, o_ref, dacc, hacc = refs
            halo_ref = None
        t = pl.program_id(1)  # D-tile index

        # ---- Stage 1: max over D (front zero-pad pad_d); window rows for local
        # output j are input rows j*s + r - pad_d. --------------------------------
        dacc[...] = x_ref[pl.ds(0, td, stride=s), :, :]  # r = pad_d
        for r in range(pad_d + 1, s):
            dacc[...] = jnp.maximum(
                dacc[...], x_ref[pl.ds(r - pad_d, td, stride=s), :, :])
        for r in range(pad_d):  # window rows that fall before this block
            if td > 1:
                dacc[pl.ds(1, td - 1), :, :] = jnp.maximum(
                    dacc[pl.ds(1, td - 1), :, :],
                    x_ref[pl.ds(s + r - pad_d, td - 1, stride=s), :, :])
            if has_halo:
                prev = halo_ref[pl.ds(s - pad_d + r, 1), :, :]
                prev = jnp.where(t > 0, prev, jnp.zeros_like(prev))
            else:  # single D tile: rows before the array are the zero pad
                prev = jnp.zeros((1, H, W), dtype=dtype)
            dacc[pl.ds(0, 1), :, :] = jnp.maximum(dacc[pl.ds(0, 1), :, :], prev)

        # ---- Stage 2: max over H (sublane axis), front zero-pad pad_h. ----------
        hacc[...] = dacc[:, pl.ds(0, Ho, stride=s), :]  # r = pad_h
        for r in range(pad_h + 1, s):
            hacc[...] = jnp.maximum(
                hacc[...], dacc[:, pl.ds(r - pad_h, Ho, stride=s), :])
        for r in range(pad_h):
            if Ho > 1:
                hacc[:, pl.ds(1, Ho - 1), :] = jnp.maximum(
                    hacc[:, pl.ds(1, Ho - 1), :],
                    dacc[:, pl.ds(s + r - pad_h, Ho - 1, stride=s), :])
        if pad_h > 0:  # zero padding feeds output H row 0
            hacc[:, pl.ds(0, 1), :] = jnp.maximum(hacc[:, pl.ds(0, 1), :], 0.0)

        # ---- Stage 3: max over W (lane axis) via one-hot selection matmuls. -----
        # Column j of sel_r picks input lane j*s + r - pad_w; out-of-range columns
        # are all-zero, which reproduces the zero padding exactly.  Cheap VPU iota
        # compares + MXU work that is otherwise idle; avoids lane-strided loads.
        w_ids = lax.broadcasted_iota(jnp.int32, (W, Wo), 0)
        j_ids = lax.broadcasted_iota(jnp.int32, (W, Wo), 1)
        sels = [(w_ids == j_ids * s + (r - pad_w)).astype(dtype) for r in range(s)]
        for d in range(td):
            row = hacc[d, :, :]  # (Ho, W)
            best = jnp.dot(row, sels[0], preferred_element_type=jnp.float32)
            for r in range(1, s):
                best = jnp.maximum(
                    best, jnp.dot(row, sels[r], preferred_element_type=jnp.float32))
            o_ref[d, :, :] = best.astype(dtype)

    return kernel


def pad_max_pool3d(x, kernel_size, stride, return_pad=False):
    """JAX/Pallas equivalent of PadMaxPool3d.forward (return_indices=False).

    x: (N, C, D, H, W) float array (PyTorch NCDHW layout, kept as-is).
    """
    if kernel_size != stride:
        # TODO(synk): kernel_size != stride (overlapping windows) not implemented;
        # BaseModel only uses PadMaxPool3d(2, 2).
        raise NotImplementedError("Pallas PadMaxPool3d supports kernel_size == stride only.")

    N, C, D, H, W = x.shape
    s = int(stride)
    pad_d, pad_h, pad_w = [(s - dim % s) % s for dim in (D, H, W)]
    Do, Ho, Wo = (D + pad_d) // s, (H + pad_h) // s, (W + pad_w) // s
    B = N * C
    dtype = x.dtype
    itemsize = jnp.dtype(dtype).itemsize

    # ---- D-tile size: largest tile whose double-buffered VMEM footprint fits
    # ~1/3 of this generation's VMEM (sized so v7x's 64 MiB is comfortable). ----
    vmem_cap = _vmem_capacity_bytes()
    budget = vmem_cap // 3
    sub = max(8, 32 // max(1, itemsize))          # sublane packing multiple
    h_rows, ho_rows = _round_up(H, sub), _round_up(Ho, sub)
    w_lanes, wo_lanes = _round_up(W, 128), _round_up(Wo, 128)

    def vmem_estimate(td):
        main = 2 * td * s * h_rows * w_lanes * itemsize       # double-buffered in
        halo = (2 * s * h_rows * w_lanes * itemsize) if pad_d else 0
        outb = 2 * td * ho_rows * wo_lanes * itemsize         # double-buffered out
        dacc = td * h_rows * w_lanes * itemsize
        hacc = td * ho_rows * w_lanes * itemsize
        return main + halo + outb + dacc + hacc

    td = 1
    for cand in range(1, min(Do, 16) + 1):
        if vmem_estimate(cand) <= budget:
            td = cand
    num_d_tiles = pl.cdiv(Do, td)
    has_halo = (pad_d > 0) and (num_d_tiles > 1)

    xr = x.reshape(B, D, H, W)  # free: collapse N and C (no transpose, no copy)

    in_specs = [pl.BlockSpec((None, td * s, H, W), lambda b, t: (b, t, 0, 0))]
    inputs = [xr]
    if has_halo:
        in_specs.append(
            pl.BlockSpec((None, s, H, W),
                         lambda b, t: (b, jnp.maximum(t * td - 1, 0), 0, 0)))
        inputs.append(xr)

    kernel = _make_pool_kernel(s=s, td=td, pad_d=pad_d, pad_h=pad_h, pad_w=pad_w,
                               H=H, W=W, Ho=Ho, Wo=Wo, has_halo=has_halo, dtype=dtype)

    out = pl.pallas_call(
        kernel,
        out_shape=jax.ShapeDtypeStruct((B, Do, Ho, Wo), dtype),
        grid=(B, num_d_tiles),
        in_specs=in_specs,
        out_specs=pl.BlockSpec((None, td, Ho, Wo), lambda b, t: (b, t, 0, 0)),
        scratch_shapes=[pltpu.VMEM((td, H, W), dtype),
                        pltpu.VMEM((td, Ho, W), dtype)],
        compiler_params=pltpu.CompilerParams(
            dimension_semantics=("parallel", "parallel"),
            vmem_limit_bytes=int(min(vmem_cap * 3 // 4, 100 * 1024 * 1024))),
    )(*inputs)

    out = out.reshape(N, C, Do, Ho, Wo)
    # TODO(synk): return_indices=True (PyTorch MaxPool3d flat argmax indices) is
    # not implemented; the module's default forward does not request it.
    if return_pad:
        return out, (pad_w, 0, pad_h, 0, pad_d, 0)
    return out


def _reference(x, kernel_size, stride):
    s = stride
    _, _, D, H, W = x.shape
    pd, ph, pw = [(s - d % s) % s for d in (D, H, W)]
    xp = jnp.pad(x, ((0, 0), (0, 0), (pd, 0), (ph, 0), (pw, 0)), constant_values=0)
    return lax.reduce_window(
        xp, -jnp.inf, lax.max,
        (1, 1, kernel_size, kernel_size, kernel_size),
        (1, 1, stride, stride, stride), "VALID")


if __name__ == "__main__":
    key = jax.random.PRNGKey(0)
    kernel_size = stride = 2
    cases = [
        (2, 4, 7, 9, 11),     # odd D/H/W -> front padding on every spatial axis
        (1, 2, 37, 10, 12),   # odd D only -> multiple D tiles + cross-tile halo
        (1, 2, 40, 12, 16),   # even dims  -> multiple D tiles, no padding at all
        (1, 1, 8, 9, 13),     # H/W padding only, single D tile
        (1, 2, 11, 20, 130),  # W > 128 -> pooling window straddles a lane register
    ]
    for shape in cases:
        key, sub = jax.random.split(key)
        x = jax.random.normal(sub, shape, dtype=jnp.float32)
        out, _ = pad_max_pool3d(x, kernel_size, stride, return_pad=True)
        out = jax.block_until_ready(out)
        ref = _reference(x, kernel_size, stride)
        assert out.shape == ref.shape, (shape, out.shape, ref.shape)
        assert jnp.allclose(out, ref), f"Pallas output mismatch for shape {shape}"

    # pad tuple matches the PyTorch module's (w, 0, h, 0, d, 0) convention
    _, pad = pad_max_pool3d(
        jax.random.normal(key, (1, 1, 7, 9, 11), dtype=jnp.float32),
        kernel_size, stride, return_pad=True)
    assert pad == (1, 0, 1, 0, 1, 0), pad

    print("KERNEL_OK")
</pallas_src>

<mosaic_0001>
module attributes {stable_mosaic.version = 11 : i64} {
  func.func @kernel(%arg0: i32, %arg1: i32, %arg2: memref<1x8x9x11xf32, #tpu.memory_space<vmem>>, %arg3: memref<1x4x5x6xf32, #tpu.memory_space<vmem>>, %arg4: memref<4x9x11xf32, #tpu.memory_space<vmem>>, %arg5: memref<4x5x11xf32, #tpu.memory_space<vmem>>) attributes {dimension_semantics = [#tpu.dimension_semantics<parallel>, #tpu.dimension_semantics<parallel>], iteration_bounds = array<i64: 8, 1>, scalar_prefetch = 0 : i64, scratch_operands = 2 : i64, tpu.core_type = #tpu.core_type<tc>, window_params = [{transform_indices = @transform_0, window_bounds = array<i64: 1, 8, 9, 11>}, {transform_indices = @transform_1, window_bounds = array<i64: 1, 4, 5, 6>}]} {
    %c0 = arith.constant 0 : index
    %c0_0 = arith.constant 0 : index
    %c0_1 = arith.constant 0 : index
    %c0_2 = arith.constant 0 : index
    %0 = tpu.strided_load %arg2[%c0, %c0_0, %c0_1, %c0_2] {strides = array<i32: 1, 2, 1, 1>} : memref<1x8x9x11xf32, #tpu.memory_space<vmem>>, vector<1x4x9x11xf32>
    %1 = vector.shape_cast %0 : vector<1x4x9x11xf32> to vector<4x9x11xf32>
    %c0_3 = arith.constant 0 : index
    %c0_4 = arith.constant 0 : index
    %c0_5 = arith.constant 0 : index
    %2 = vector.load %arg4[%c0_3, %c0_4, %c0_5] : memref<4x9x11xf32, #tpu.memory_space<vmem>>, vector<4x9x11xf32>
    tpu.vector_store %arg4[%c0_3, %c0_4, %c0_5], %1 {strides = array<i32>} : memref<4x9x11xf32, #tpu.memory_space<vmem>>, vector<4x9x11xf32>,
    %c1 = arith.constant 1 : index
    %c0_6 = arith.constant 0 : index
    %c0_7 = arith.constant 0 : index
    %3 = vector.load %arg4[%c1, %c0_6, %c0_7] : memref<4x9x11xf32, #tpu.memory_space<vmem>>, vector<3x9x11xf32>
    %c0_8 = arith.constant 0 : index
    %c1_9 = arith.constant 1 : index
    %c0_10 = arith.constant 0 : index
    %c0_11 = arith.constant 0 : index
    %4 = tpu.strided_load %arg2[%c0_8, %c1_9, %c0_10, %c0_11] {strides = array<i32: 1, 2, 1, 1>} : memref<1x8x9x11xf32, #tpu.memory_space<vmem>>, vector<1x3x9x11xf32>
    %5 = vector.shape_cast %4 : vector<1x3x9x11xf32> to vector<3x9x11xf32>
    %6 = arith.maximumf %3, %5 : vector<3x9x11xf32>
    %c1_12 = arith.constant 1 : index
    %c0_13 = arith.constant 0 : index
    %c0_14 = arith.constant 0 : index
    %7 = vector.load %arg4[%c1_12, %c0_13, %c0_14] : memref<4x9x11xf32, #tpu.memory_space<vmem>>, vector<3x9x11xf32>
    tpu.vector_store %arg4[%c1_12, %c0_13, %c0_14], %6 {strides = array<i32>} : memref<4x9x11xf32, #tpu.memory_space<vmem>>, vector<3x9x11xf32>,
    %cst = arith.constant 0.000000e+00 : f32
    %8 = vector.broadcast %cst : f32 to vector<1x9x11xf32>
    %c0_15 = arith.constant 0 : index
    %c0_16 = arith.constant 0 : index
    %c0_17 = arith.constant 0 : index
    %9 = vector.load %arg4[%c0_15, %c0_16, %c0_17] : memref<4x9x11xf32, #tpu.memory_space<vmem>>, vector<1x9x11xf32>
    %10 = arith.maximumf %9, %8 : vector<1x9x11xf32>
    %c0_18 = arith.constant 0 : index
    %c0_19 = arith.constant 0 : index
    %c0_20 = arith.constant 0 : index
    %11 = vector.load %arg4[%c0_18, %c0_19, %c0_20] : memref<4x9x11xf32, #tpu.memory_space<vmem>>, vector<1x9x11xf32>
    tpu.vector_store %arg4[%c0_18, %c0_19, %c0_20], %10 {strides = array<i32>} : memref<4x9x11xf32, #tpu.memory_space<vmem>>, vector<1x9x11xf32>,
    %c0_21 = arith.constant 0 : index
    %c0_22 = arith.constant 0 : index
    %c0_23 = arith.constant 0 : index
    %12 = tpu.strided_load %arg4[%c0_21, %c0_22, %c0_23] {strides = array<i32: 1, 2, 1>} : memref<4x9x11xf32, #tpu.memory_space<vmem>>, vector<4x5x11xf32>
    %c0_24 = arith.constant 0 : index
    %c0_25 = arith.constant 0 : index
    %c0_26 = arith.constant 0 : index
    %13 = vector.load %arg5[%c0_24, %c0_25, %c0_26] : memref<4x5x11xf32, #tpu.memory_space<vmem>>, vector<4x5x11xf32>
    tpu.vector_store %arg5[%c0_24, %c0_25, %c0_26], %12 {strides = array<i32>} : memref<4x5x11xf32, #tpu.memory_space<vmem>>, vector<4x5x11xf32>,
    %c0_27 = arith.constant 0 : index
    %c1_28 = arith.constant 1 : index
    %c0_29 = arith.constant 0 : index
    %14 = vector.load %arg5[%c0_27, %c1_28, %c0_29] : memref<4x5x11xf32, #tpu.memory_space<vmem>>, vector<4x4x11xf32>
    %c0_30 = arith.constant 0 : index
    %c1_31 = arith.constant 1 : index
    %c0_32 = arith.constant 0 : index
    %15 = tpu.strided_load %arg4[%c0_30, %c1_31, %c0_32] {strides = array<i32: 1, 2, 1>} : memref<4x9x11xf32, #tpu.memory_space<vmem>>, vector<4x4x11xf32>
    %16 = arith.maximumf %14, %15 : vector<4x4x11xf32>
    %c0_33 = arith.constant 0 : index
    %c1_34 = arith.constant 1 : index
    %c0_35 = arith.constant 0 : index
    %17 = vector.load %arg5[%c0_33, %c1_34, %c0_35] : memref<4x5x11xf32, #tpu.memory_space<vmem>>, vector<4x4x11xf32>
    tpu.vector_store %arg5[%c0_33, %c1_34, %c0_35], %16 {strides = array<i32>} : memref<4x5x11xf32, #tpu.memory_space<vmem>>, vector<4x4x11xf32>,
    %c0_36 = arith.constant 0 : index
    %c0_37 = arith.constant 0 : index
    %c0_38 = arith.constant 0 : index
    %18 = vector.load %arg5[%c0_36, %c0_37, %c0_38] : memref<4x5x11xf32, #tpu.memory_space<vmem>>, vector<4x1x11xf32>
    %cst_39 = arith.constant 0.000000e+00 : f32
    %19 = vector.broadcast %cst_39 : f32 to vector<4x1x11xf32>
    %20 = arith.maximumf %18, %19 : vector<4x1x11xf32>
    %c0_40 = arith.constant 0 : index
    %c0_41 = arith.constant 0 : index
    %c0_42 = arith.constant 0 : index
    %21 = vector.load %arg5[%c0_40, %c0_41, %c0_42] : memref<4x5x11xf32, #tpu.memory_space<vmem>>, vector<4x1x11xf32>
    tpu.vector_store %arg5[%c0_40, %c0_41, %c0_42], %20 {strides = array<i32>} : memref<4x5x11xf32, #tpu.memory_space<vmem>>, vector<4x1x11xf32>,
    %22 = tpu.iota {dimensions = array<i32: 0>} : vector<11x6xi32>
    %23 = tpu.iota {dimensions = array<i32: 1>} : vector<11x6xi32>
    %c2_i32 = arith.constant 2 : i32
    %24 = vector.broadcast %c2_i32 : i32 to vector<11x6xi32>
    %25 = arith.muli %23, %24 : vector<11x6xi32>
    %c-1_i32 = arith.constant -1 : i32
    %26 = vector.broadcast %c-1_i32 : i32 to vector<11x6xi32>
    %27 = arith.addi %25, %26 : vector<11x6xi32>
    %28 = arith.cmpi eq, %22, %27 : vector<11x6xi32>
    %29 = arith.extui %28 : vector<11x6xi1> to vector<11x6xi32>
    %30 = arith.sitofp %29 : vector<11x6xi32> to vector<11x6xf32>
    %c2_i32_43 = arith.constant 2 : i32
    %31 = vector.broadcast %c2_i32_43 : i32 to vector<11x6xi32>
    %32 = arith.muli %23, %31 : vector<11x6xi32>
    %c0_i32 = arith.constant 0 : i32
    %33 = vector.broadcast %c0_i32 : i32 to vector<11x6xi32>
    %34 = arith.addi %32, %33 : vector<11x6xi32>
    %35 = arith.cmpi eq, %22, %34 : vector<11x6xi32>
    %36 = arith.extui %35 : vector<11x6xi1> to vector<11x6xi32>
    %37 = arith.sitofp %36 : vector<11x6xi32> to vector<11x6xf32>
    %c0_44 = arith.constant 0 : index
    %c0_45 = arith.constant 0 : index
    %c0_46 = arith.constant 0 : index
    %38 = vector.load %arg5[%c0_44, %c0_45, %c0_46] : memref<4x5x11xf32, #tpu.memory_space<vmem>>, vector<1x5x11xf32>
    %39 = vector.shape_cast %38 : vector<1x5x11xf32> to vector<5x11xf32>
    %cst_47 = arith.constant dense<0.000000e+00> : vector<5x6xf32>
    %40 = tpu.matmul %39, %30, %cst_47 {dimension_numbers = #tpu.dot_dimension_numbers<[1], [0], [0], [1], [0, 0, 1, 1], [], []>} : vector<5x11xf32>, vector<11x6xf32>, vector<5x6xf32> -> vector<5x6xf32>
    %cst_48 = arith.constant dense<0.000000e+00> : vector<5x6xf32>
    %41 = tpu.matmul %39, %37, %cst_48 {dimension_numbers = #tpu.dot_dimension_numbers<[1], [0], [0], [1], [0, 0, 1, 1], [], []>} : vector<5x11xf32>, vector<11x6xf32>, vector<5x6xf32> -> vector<5x6xf32>
    %42 = arith.maximumf %40, %41 : vector<5x6xf32>
    %c0_49 = arith.constant 0 : index
    %c0_50 = arith.constant 0 : index
    %c0_51 = arith.constant 0 : index
    %c0_52 = arith.constant 0 : index
    %43 = vector.load %arg3[%c0_49, %c0_50, %c0_51, %c0_52] : memref<1x4x5x6xf32, #tpu.memory_space<vmem>>, vector<1x1x5x6xf32>
    %44 = vector.shape_cast %43 : vector<1x1x5x6xf32> to vector<5x6xf32>
    %45 = vector.shape_cast %42 : vector<5x6xf32> to vector<1x1x5x6xf32>
    tpu.vector_store %arg3[%c0_49, %c0_50, %c0_51, %c0_52], %45 {strides = array<i32>} : memref<1x4x5x6xf32, #tpu.memory_space<vmem>>, vector<1x1x5x6xf32>,
    %c1_53 = arith.constant 1 : index
    %c0_54 = arith.constant 0 : index
    %c0_55 = arith.constant 0 : index
    %46 = vector.load %arg5[%c1_53, %c0_54, %c0_55] : memref<4x5x11xf32, #tpu.memory_space<vmem>>, vector<1x5x11xf32>
    %47 = vector.shape_cast %46 : vector<1x5x11xf32> to vector<5x11xf32>
    %cst_56 = arith.constant dense<0.000000e+00> : vector<5x6xf32>
    %48 = tpu.matmul %47, %30, %cst_56 {dimension_numbers = #tpu.dot_dimension_numbers<[1], [0], [0], [1], [0, 0, 1, 1], [], []>} : vector<5x11xf32>, vector<11x6xf32>, vector<5x6xf32> -> vector<5x6xf32>
    %cst_57 = arith.constant dense<0.000000e+00> : vector<5x6xf32>
    %49 = tpu.matmul %47, %37, %cst_57 {dimension_numbers = #tpu.dot_dimension_numbers<[1], [0], [0], [1], [0, 0, 1, 1], [], []>} : vector<5x11xf32>, vector<11x6xf32>, vector<5x6xf32> -> vector<5x6xf32>
    %50 = arith.maximumf %48, %49 : vector<5x6xf32>
    %c0_58 = arith.constant 0 : index
    %c1_59 = arith.constant 1 : index
    %c0_60 = arith.constant 0 : index
    %c0_61 = arith.constant 0 : index
    %51 = vector.load %arg3[%c0_58, %c1_59, %c0_60, %c0_61] : memref<1x4x5x6xf32, #tpu.memory_space<vmem>>, vector<1x1x5x6xf32>
    %52 = vector.shape_cast %51 : vector<1x1x5x6xf32> to vector<5x6xf32>
    %53 = vector.shape_cast %50 : vector<5x6xf32> to vector<1x1x5x6xf32>
    tpu.vector_store %arg3[%c0_58, %c1_59, %c0_60, %c0_61], %53 {strides = array<i32>} : memref<1x4x5x6xf32, #tpu.memory_space<vmem>>, vector<1x1x5x6xf32>,
    %c2 = arith.constant 2 : index
    %c0_62 = arith.constant 0 : index
    %c0_63 = arith.constant 0 : index
    %54 = vector.load %arg5[%c2, %c0_62, %c0_63] : memref<4x5x11xf32, #tpu.memory_space<vmem>>, vector<1x5x11xf32>
    %55 = vector.shape_cast %54 : vector<1x5x11xf32> to vector<5x11xf32>
    %cst_64 = arith.constant dense<0.000000e+00> : vector<5x6xf32>
    %56 = tpu.matmul %55, %30, %cst_64 {dimension_numbers = #tpu.dot_dimension_numbers<[1], [0], [0], [1], [0, 0, 1, 1], [], []>} : vector<5x11xf32>, vector<11x6xf32>, vector<5x6xf32> -> vector<5x6xf32>
    %cst_65 = arith.constant dense<0.000000e+00> : vector<5x6xf32>
    %57 = tpu.matmul %55, %37, %cst_65 {dimension_numbers = #tpu.dot_dimension_numbers<[1], [0], [0], [1], [0, 0, 1, 1], [], []>} : vector<5x11xf32>, vector<11x6xf32>, vector<5x6xf32> -> vector<5x6xf32>
    %58 = arith.maximumf %56, %57 : vector<5x6xf32>
    %c0_66 = arith.constant 0 : index
    %c2_67 = arith.constant 2 : index
    %c0_68 = arith.constant 0 : index
    %c0_69 = arith.constant 0 : index
    %59 = vector.load %arg3[%c0_66, %c2_67, %c0_68, %c0_69] : memref<1x4x5x6xf32, #tpu.memory_space<vmem>>, vector<1x1x5x6xf32>
    %60 = vector.shape_cast %59 : vector<1x1x5x6xf32> to vector<5x6xf32>
    %61 = vector.shape_cast %58 : vector<5x6xf32> to vector<1x1x5x6xf32>
    tpu.vector_store %arg3[%c0_66, %c2_67, %c0_68, %c0_69], %61 {strides = array<i32>} : memref<1x4x5x6xf32, #tpu.memory_space<vmem>>, vector<1x1x5x6xf32>,
    %c3 = arith.constant 3 : index
    %c0_70 = arith.constant 0 : index
    %c0_71 = arith.constant 0 : index
    %62 = vector.load %arg5[%c3, %c0_70, %c0_71] : memref<4x5x11xf32, #tpu.memory_space<vmem>>, vector<1x5x11xf32>
    %63 = vector.shape_cast %62 : vector<1x5x11xf32> to vector<5x11xf32>
    %cst_72 = arith.constant dense<0.000000e+00> : vector<5x6xf32>
    %64 = tpu.matmul %63, %30, %cst_72 {dimension_numbers = #tpu.dot_dimension_numbers<[1], [0], [0], [1], [0, 0, 1, 1], [], []>} : vector<5x11xf32>, vector<11x6xf32>, vector<5x6xf32> -> vector<5x6xf32>
    %cst_73 = arith.constant dense<0.000000e+00> : vector<5x6xf32>
    %65 = tpu.matmul %63, %37, %cst_73 {dimension_numbers = #tpu.dot_dimension_numbers<[1], [0], [0], [1], [0, 0, 1, 1], [], []>} : vector<5x11xf32>, vector<11x6xf32>, vector<5x6xf32> -> vector<5x6xf32>
    %66 = arith.maximumf %64, %65 : vector<5x6xf32>
    %c0_74 = arith.constant 0 : index
    %c3_75 = arith.constant 3 : index
    %c0_76 = arith.constant 0 : index
    %c0_77 = arith.constant 0 : index
    %67 = vector.load %arg3[%c0_74, %c3_75, %c0_76, %c0_77] : memref<1x4x5x6xf32, #tpu.memory_space<vmem>>, vector<1x1x5x6xf32>
    %68 = vector.shape_cast %67 : vector<1x1x5x6xf32> to vector<5x6xf32>
    %69 = vector.shape_cast %66 : vector<5x6xf32> to vector<1x1x5x6xf32>
    tpu.vector_store %arg3[%c0_74, %c3_75, %c0_76, %c0_77], %69 {strides = array<i32>} : memref<1x4x5x6xf32, #tpu.memory_space<vmem>>, vector<1x1x5x6xf32>,
    return
  }
  func.func @transform_0(%arg0: i32, %arg1: i32) -> (i32, i32, i32, i32) {
    %c0_i32 = arith.constant 0 : i32
    %c0_i32_0 = arith.constant 0 : i32
    %c0_i32_1 = arith.constant 0 : i32
    return %arg0, %arg1, %c0_i32, %c0_i32_0 : i32, i32, i32, i32
  }
  func.func @transform_1(%arg0: i32, %arg1: i32) -> (i32, i32, i32, i32) {
    %c0_i32 = arith.constant 0 : i32
    %c0_i32_0 = arith.constant 0 : i32
    %c0_i32_1 = arith.constant 0 : i32
    return %arg0, %arg1, %c0_i32, %c0_i32_0 : i32, i32, i32, i32
  }
}

</mosaic_0001>

<bundles_post_ra>
// kernel: tpu_custom_call.1
= control target key start
LH: loop header
LB: loop body
LE: loop exit
PB: predicated region body
PF: predicated region fallthrough
CT: control target
= control target key end

     0   :  { %s687_s6 = smov 0   ;;  %s689_s7 = smov 0   ;;  %s788_s0 = inlined_call_operand.vmem [shape: f32[8,7,9,11], index: 0, kind: input, shape index: {}]   ;;  %s789_s1 = inlined_call_operand.vmem [shape: f32[8,4,5,6], index: 1, kind: output, shape index: {}]  }
   0x1   :  { %s691_s8 = smov 0  }
   0x2 LB: > { %s23_s9 = sadd.s32 1, %s669_s7  ;;  %p580_p0 = scmp.ge.s32.totalorder %s673_s8, 1  ;;  %s673_s8 = sphi %s691_s8, %s11_s8   ;;  %s669_s7 = sphi %s689_s7, %s791_s7   ;;  %s665_s6 = sphi %s687_s6, %s790_s6  }
   0x3   : > { %p25_p1 = scmp.ge.s32.totalorder %s23_s9, 8  ;;  %p115_p2 = scmp.lt.s32.totalorder %s673_s8, 9 }
   0x5   : > { %s793_s9 = smov (%p25_p1, %s23_s9), 0  ;;  %p116_p3 = pnand %p580_p0, %p115_p2 }
   0x6   : > { %p151_p4 = scmp.lt.s32.totalorder (!%p116_p3), %s665_s6, 7 }
   0x7   : > { %119 = sbr.rel (%p116_p3) target bundleno = 198 (0xc6), region = 24 }
   0xc   : > { %v269_v0 = vlaneseq  ;;  %s795_s6 = smov (!%p151_p4, %s665_s6), 7  ;;  %vm292_vm0 = vcmask 1042432   ;;  %vm182_vm1 = vcmask 89088   ;;  %vm184_vm3 = vcmask 81920  }
   0xd   : > { %s624_s10 = smul.u32 112, %s795_s6  ;;  %v675_v6 = vmov 0.0   ;;  %v676_v14 = vmov 1.0   ;;  %vm231_vm7 = vcmask 86016   ;;  %vm252_vm8 = vcmask 84992   ;;  %s623_s14 = sshll.u32 %s795_s6, 5 }
   0xe   : > { %v270_v1 = vshrl.u32 %v269_v0, 7  ;;  %v273_v2 = vand.u32 127, %v269_v0  ;;  %s172_s17 = scalar_lea.vmem %s789_s1, %s623_s14  ;;  %vm340_vm9 = vcmask 45056  }
   0xf   : > { %s711_s13 = scalar_lea.vmem %s788_s0, %s624_s10 }
  0x10   : > { %v271_v3 = vadd.s32 8, %v270_v1  ;;  %v274_v4 = vmul.u32 2, %v273_v2  ;;  %v176_v8 = vld [vmem:[%s711_s13 + $0x20] sm:$0xff]  ;;  %v177_v9 = vld [vmem:[%s711_s13 + $0x28] sm:$0x1]  ;;  %v584_v18 = vld [vmem:[%s711_s13 + $0x10] sm:$0xff] }
  0x11   : > { %186 = vst.msk [vmem:[#allocation2 + $0x10] sm:$0xff] %vm182_vm1, %v176_v8  ;;  %v174_v10 = vld [vmem:[%s711_s13] sm:$0xff]  ;;  %v175_v11 = vld [vmem:[%s711_s13 + $0x8] sm:$0x1]  ;;  %v585_v19 = vld [vmem:[%s711_s13 + $0x18] sm:$0x1] }
  0x12   : > { %v275_v5 = vadd.s32 4294967295, %v274_v4  ;;  %vm283_vm2 = vcmp.eq.s32.totalorder %v271_v3, %v274_v4  ;;  %vm282_vm4 = vcmp.eq.s32.totalorder %v270_v1, %v274_v4  ;;  %187 = vst.msk [vmem:[#allocation2 + $0x18] sm:$0x1] %vm184_vm3, %v177_v9  ;;  %v180_v13 = vld [vmem:[%s711_s13 + $0x60] sm:$0xff]  ;;  %v181_v15 = vld [vmem:[%s711_s13 + $0x68] sm:$0x1] }
  0x13   : > { %v593_v7 = vsel %vm283_vm2, 1.0, %v675_v6  ;;  %183 = vst.msk [vmem:[#allocation2] sm:$0xff] %vm182_vm1, %v174_v10  ;;  %v178_v16 = vld [vmem:[%s711_s13 + $0x40] sm:$0xff]  ;;  %v179_v17 = vld [vmem:[%s711_s13 + $0x48] sm:$0x1]  ;;  %v588_v25 = vld [vmem:[%s711_s13 + $0x50] sm:$0xff] }
  0x14   : > { %vm277_vm5 = vcmp.eq.s32.totalorder %v271_v3, %v275_v5  ;;  %603 = vmatpush.msk.msra.mxu3 %vm292_vm0, %v593_v7  ;;  %597 = vmatpush.msk.msra.mxu1 %vm292_vm0, %v593_v7  ;;  %vm276_vm6 = vcmp.eq.s32.totalorder %v270_v1, %v275_v5  ;;  %185 = vst.msk [vmem:[#allocation2 + $0x8] sm:$0x1] %vm184_vm3, %v175_v11  ;;  %v589_v28 = vld [vmem:[%s711_s13 + $0x58] sm:$0x1]  ;;  %v586_v31 = vld [vmem:[%s711_s13 + $0x30] sm:$0xff] }
  0x15   : > { %v591_v12 = vsel %vm277_vm5, 1.0, %v675_v6  ;;  %190 = vst.msk [vmem:[#allocation2 + $0x30] sm:$0xff] %vm182_vm1, %v180_v13  ;;  %v587_v34 = vld [vmem:[%s711_s13 + $0x38] sm:$0x1] }
  0x16   : > { %600 = vmatpush.msk.msra.mxu2 %vm292_vm0, %v591_v12  ;;  %604 = vmatpush.msk.msra.mxu3 %vm282_vm4, %v676_v14  ;;  %191 = vst.msk [vmem:[#allocation2 + $0x38] sm:$0x1] %vm184_vm3, %v181_v15 }
  0x17   : > { %594 = vmatpush.msk.msra.mxu0 %vm292_vm0, %v591_v12  ;;  %598 = vmatpush.msk.msra.mxu1 %vm282_vm4, %v676_v14  ;;  %188 = vst.msk [vmem:[#allocation2 + $0x20] sm:$0xff] %vm182_vm1, %v178_v16 }
  0x18   : > { %617 = vmatpush.msk.msrb.mxu3 %vm292_vm0, %v593_v7  ;;  %601 = vmatpush.msk.msra.mxu2 %vm276_vm6, %v676_v14  ;;  %v193_v20 = vld [vmem:[#allocation2 + $0x10] sm:$0xff]  ;;  %189 = vst.msk [vmem:[#allocation2 + $0x28] sm:$0x1] %vm184_vm3, %v179_v17 }
  0x19   : > { %595 = vmatpush.msk.msra.mxu0 %vm276_vm6, %v676_v14  ;;  %610 = vmatpush.msk.msrb.mxu1 %vm292_vm0, %v593_v7  ;;  %v194_v21 = vld [vmem:[#allocation2 + $0x18] sm:$0x1]  ;;  %v206_v22 = vmax.f32 %v193_v20, %v584_v18 }
  0x1a   : > { %614 = vmatpush.msk.msrb.mxu2 %vm292_vm0, %v591_v12  ;;  %618 = vmatpush.msk.msrb.mxu3 %vm282_vm4, %v676_v14  ;;  %v207_v23 = vmax.f32 %v194_v21, %v585_v19  ;;  %v218_v24 = vld [vmem:[#allocation2] sm:$0xff] }
  0x1b   : > { %607 = vmatpush.msk.msrb.mxu0 %vm292_vm0, %v591_v12  ;;  %611 = vmatpush.msk.msrb.mxu1 %vm282_vm4, %v676_v14  ;;  %212 = vst.msk [vmem:[#allocation2 + $0x10] sm:$0xff] %vm182_vm1, %v206_v22  ;;  %v219_v26 = vld [vmem:[#allocation2 + $0x8] sm:$0x1]  ;;  %v220_v27 = vmax.f32 %v218_v24, 0.0 }
  0x1c   : > { %615 = vmatpush.msk.msrb.mxu2 %vm276_vm6, %v676_v14  ;;  %213 = vst.msk [vmem:[#allocation2 + $0x18] sm:$0x1] %vm184_vm3, %v207_v23  ;;  %v221_v29 = vmax.f32 %v219_v26, 0.0  ;;  %v197_v30 = vld [vmem:[#allocation2 + $0x30] sm:$0xff] }
  0x1d   : > { %608 = vmatpush.msk.msrb.mxu0 %vm276_vm6, %v676_v14  ;;  %222 = vst.msk [vmem:[#allocation2] sm:$0xff] %vm182_vm1, %v220_v27  ;;  %v198_v32 = vld [vmem:[#allocation2 + $0x38] sm:$0x1]  ;;  %v210_v33 = vmax.f32 %v197_v30, %v588_v25 }
  0x1e   : > { %223 = vst.msk [vmem:[#allocation2 + $0x8] sm:$0x1] %vm184_vm3, %v221_v29  ;;  %v211_v35 = vmax.f32 %v198_v32, %v589_v28  ;;  %v195_v36 = vld [vmem:[#allocation2 + $0x20] sm:$0xff] }
  0x1f   : > { %216 = vst.msk [vmem:[#allocation2 + $0x30] sm:$0xff] %vm182_vm1, %v210_v33  ;;  %v196_v37 = vld [vmem:[#allocation2 + $0x28] sm:$0x1]  ;;  %v208_v38 = vmax.f32 %v195_v36, %v586_v31 }
  0x20   : > { %217 = vst.msk [vmem:[#allocation2 + $0x38] sm:$0x1] %vm184_vm3, %v211_v35  ;;  %v209_v39 = vmax.f32 %v196_v37, %v587_v34 }
  0x21   : > { %214 = vst.msk [vmem:[#allocation2 + $0x20] sm:$0xff] %vm182_vm1, %v208_v38 }
  0x22   : > { %215 = vst.msk [vmem:[#allocation2 + $0x28] sm:$0x1] %vm184_vm3, %v209_v39  ;;  %v243_v43 = vld [vmem:[#allocation2 + $0x11] ss:$2 sm:$0xf] }
  0x23   : > { %v226_v40 = vld [vmem:[#allocation2 + $0x10] ss:$2 sm:$0x1f] }
  0x24   : > { %233 = vst.msk [vmem:[#allocation3 + $0x8] sm:$0x1f] %vm231_vm7, %v226_v40  ;;  %v241_v45 = vld [vmem:[#allocation2 + $0x1] ss:$2 sm:$0xf] }
  0x25   : > { %v224_v41 = vld [vmem:[#allocation2] ss:$2 sm:$0x1f] }
  0x26   : > { %232 = vst.msk [vmem:[#allocation3] sm:$0x1f] %vm231_vm7, %v224_v41  ;;  %v247_v50 = vld [vmem:[#allocation2 + $0x31] ss:$2 sm:$0xf] }
  0x27   : > { %v230_v42 = vld [vmem:[#allocation2 + $0x30] ss:$2 sm:$0x1f] }
  0x28   : > { %235 = vst.msk [vmem:[#allocation3 + $0x18] sm:$0x1f] %vm231_vm7, %v230_v42  ;;  %v245_v55 = vld [vmem:[#allocation2 + $0x21] ss:$2 sm:$0xf] }
  0x29   : > { %v228_v44 = vld [vmem:[#allocation2 + $0x20] ss:$2 sm:$0x1f] }
  0x2a   : > { %234 = vst.msk [vmem:[#allocation3 + $0x10] sm:$0x1f] %vm231_vm7, %v228_v44 }
  0x2b   : > { %v237_v46 = vld [vmem:[#allocation3 + $0x9] sm:$0xf]  ;;  %v258_v47 = vld [vmem:[#allocation3 + $0x8] sm:$0x1] }
  0x2c   : > { %v249_v48 = vmax.f32 %v237_v46, %v243_v43  ;;  %v262_v49 = vmax.f32 %v258_v47, 0.0 }
  0x2d   : > { %v236_v51 = vld [vmem:[#allocation3 + $0x1] sm:$0xf]  ;;  %v257_v52 = vld [vmem:[#allocation3] sm:$0x1] }
  0x2e   : > { %254 = vst.msk [vmem:[#allocation3 + $0x9] sm:$0xf] %vm252_vm8, %v249_v48  ;;  %v248_v53 = vmax.f32 %v236_v51, %v241_v45  ;;  %v261_v54 = vmax.f32 %v257_v52, 0.0 }
  0x2f   : > { %266 = vst.msk [vmem:[#allocation3 + $0x8] sm:$0x1] %vm184_vm3, %v262_v49  ;;  %v239_v56 = vld [vmem:[#allocation3 + $0x19] sm:$0xf]  ;;  %v260_v57 = vld [vmem:[#allocation3 + $0x18] sm:$0x1] }
  0x30   : > { %253 = vst.msk [vmem:[#allocation3 + $0x1] sm:$0xf] %vm252_vm8, %v248_v53  ;;  %v251_v58 = vmax.f32 %v239_v56, %v247_v50  ;;  %v264_v59 = vmax.f32 %v260_v57, 0.0 }
  0x31   : > { %265 = vst.msk [vmem:[#allocation3] sm:$0x1] %vm184_vm3, %v261_v54  ;;  %v238_v60 = vld [vmem:[#allocation3 + $0x11] sm:$0xf]  ;;  %v259_v61 = vld [vmem:[#allocation3 + $0x10] sm:$0x1] }
  0x32   : > { %256 = vst.msk [vmem:[#allocation3 + $0x19] sm:$0xf] %vm252_vm8, %v251_v58  ;;  %v250_v62 = vmax.f32 %v238_v60, %v245_v55  ;;  %v263_v63 = vmax.f32 %v259_v61, 0.0 }
  0x33   : > { %268 = vst.msk [vmem:[#allocation3 + $0x18] sm:$0x1] %vm184_vm3, %v264_v59 }
  0x34   : > { %255 = vst.msk [vmem:[#allocation3 + $0x11] sm:$0xf] %vm252_vm8, %v250_v62 }
  0x35   : > { %267 = vst.msk [vmem:[#allocation3 + $0x10] sm:$0x1] %vm184_vm3, %v263_v63 }
  0x36   : > { %v343_v0 = vld [vmem:[#allocation3 + $0x8] sm:$0x1f] }
  0x37   : > { %602 = vmatmul.msk.f32.vlgmr.msra.gmra.mxu2 %vm182_vm1, %v343_v0  ;;  %605 = vmatmul.msk.f32.vlgmr.msra.gmra.mxu3 %vm182_vm1, %v343_v0 }
  0x38   : > { %v288_v1 = vld [vmem:[#allocation3] sm:$0x1f] }
  0x39   : > { %596 = vmatmul.msk.f32.vlgmr.msra.gmra.mxu0 %vm182_vm1, %v288_v1  ;;  %599 = vmatmul.msk.f32.vlgmr.msra.gmra.mxu1 %vm182_vm1, %v288_v1 }
  0x3a   : > { %v439_v2 = vld [vmem:[#allocation3 + $0x18] sm:$0x1f] }
  0x3c   : > { %v391_v3 = vld [vmem:[#allocation3 + $0x10] sm:$0x1f] }
  0x3f   : > { %616 = vmatmul.msk.f32.vlgmr.msrb.gmra.mxu2 %vm182_vm1, %v439_v2  ;;  %619 = vmatmul.msk.f32.vlgmr.msrb.gmra.mxu3 %vm182_vm1, %v439_v2 }
  0x41   : > { %609 = vmatmul.msk.f32.vlgmr.msrb.gmra.mxu0 %vm182_vm1, %v391_v3  ;;  %612 = vmatmul.msk.f32.vlgmr.msrb.gmra.mxu1 %vm182_vm1, %v391_v3 }
  0xb6   : > { %v313_v4 = vpop.f32.mrf.mxu0  ;;  %v336_v5 = vpop.f32.mrf.mxu1 }
  0xb7   : > { %v339_v6 = vmax.f32 %v313_v4, %v336_v5 }
  0xb9   : > { %341 = vst.msk [vmem:[%s172_s17] sm:$0x1f] %vm340_vm9, %v339_v6 }
  0xba   : > { %v364_v7 = vpop.f32.mrf.mxu2  ;;  %v384_v8 = vpop.f32.mrf.mxu3 }
  0xbb   : > { %v387_v9 = vmax.f32 %v364_v7, %v384_v8 }
  0xbd   : > { %606 = vst.msk [vmem:[%s172_s17 + $0x8] sm:$0x1f] %vm340_vm9, %v387_v9 }
  0xbe   : > { %v412_v10 = vpop.f32.mrf.mxu0  ;;  %v432_v11 = vpop.f32.mrf.mxu1 }
  0xbf   : > { %v435_v12 = vmax.f32 %v412_v10, %v432_v11 }
  0xc1   : > { %613 = vst.msk [vmem:[%s172_s17 + $0x10] sm:$0x1f] %vm340_vm9, %v435_v12 }
  0xc2   : > { %v460_v13 = vpop.f32.mrf.mxu2  ;;  %v480_v14 = vpop.f32.mrf.mxu3 }
  0xc3   : > { %v483_v15 = vmax.f32 %v460_v13, %v480_v14 }
  0xc5   : > { %620 = vst.msk [vmem:[%s172_s17 + $0x18] sm:$0x1f] %vm340_vm9, %v483_v15 }
  0xc6 PF: > { %s11_s8 = sadd.s32 1, %s673_s8   ;;  %s790_s6 = smov %s669_s7 }
  0xc7   : > { %p8_p5 = scmp.ge.s32.totalorder %s11_s8, 10   ;;  %s791_s7 = smov %s793_s9 }
  0xc9   :  { %10 = sbr.rel (!%p8_p5) target bundleno = 2 (0x2), region = 69 }

</bundles_post_ra>
